<compile_context>
chip_gen: v6e
topology: v6e:2x2x1
jax: 0.10.0
libtpu: 0.0.40
codegen_flags: <defaults>
</compile_context>

<pallas_src>
import functools

import jax
import jax.numpy as jnp
from jax.experimental import pallas as pl
from jax.experimental.pallas import tpu as pltpu


def _ln_temporal_kernel(x_ref, alpha_ref, beta_ref, o_ref, *, eps, inv_c):
    # x_ref: (Bb, C, TT).  Normalization is independent per (batch, time-column),
    # so undefined values in masked (out-of-bounds) lanes/batches of a partial
    # last tile only affect those masked columns; Pallas masks their stores.
    x = x_ref[...].astype(jnp.float32)
    mean = jnp.sum(x, axis=1, keepdims=True) * inv_c        # (Bb, 1, TT)
    d = x - mean
    var = jnp.sum(d * d, axis=1, keepdims=True) * inv_c     # two-pass: stable
    inv_std = jax.lax.rsqrt(var + eps)                      # EUP slot, TT elems
    y = d * inv_std * alpha_ref[...] + beta_ref[...]
    o_ref[...] = y.astype(o_ref.dtype)


def _choose_tiles(B, C, T, dtype, target_bytes=2 << 20):
    """Pick (Bb, tt): lane tile tt (multiple of 128) and batch fold Bb so the
    input block is ~target_bytes, using the real (sublane-padded) footprint."""
    itemsize = jnp.dtype(dtype).itemsize
    sublane_mult = max(8, 32 // max(int(itemsize), 1))   # f32->8, bf16->16, int8->32
    c_pad = pl.cdiv(C, sublane_mult) * sublane_mult      # actual VMEM sublane rows
    t_ceil = pl.cdiv(T, 128) * 128

    bytes_per_lane_col = c_pad * itemsize                # one batch, one lane column
    tt = (target_bytes // bytes_per_lane_col) // 128 * 128
    tt = int(max(128, min(tt, t_ceil)))

    bb = 1
    if tt >= t_ceil:
        # Whole T fits in a single tile; fold batches to keep blocks large.
        block_bytes = c_pad * itemsize * tt
        bb = int(max(1, min(B, target_bytes // max(block_bytes, 1))))
    return bb, tt, c_pad, int(itemsize)


def ln_temporal(x, alpha, beta, epsilon=1e-5):
    """x: (B, C, T); alpha, beta: (1, C, 1). Normalizes over the channel axis."""
    B, C, T = x.shape
    bb, tt, c_pad, itemsize = _choose_tiles(B, C, T, x.dtype)

    # VMEM budget: double-buffered in+out blocks (native dtype) + f32 in-kernel
    # temporaries + margin.  Clamp well under the smallest physical VMEM (v7x 64 MiB).
    block_native = bb * c_pad * tt * itemsize
    block_f32 = bb * c_pad * tt * 4
    vmem_limit = 4 * block_native + 2 * block_f32 + (4 << 20)
    vmem_limit = int(min(max(vmem_limit, 16 << 20), 48 << 20))

    alpha_f32 = alpha.astype(jnp.float32)
    beta_f32 = beta.astype(jnp.float32)

    kernel = functools.partial(
        _ln_temporal_kernel, eps=float(epsilon), inv_c=1.0 / float(C))

    return pl.pallas_call(
        kernel,
        out_shape=jax.ShapeDtypeStruct((B, C, T), x.dtype),
        grid_spec=pltpu.PrefetchScalarGridSpec(
            num_scalar_prefetch=0,
            grid=(pl.cdiv(B, bb), pl.cdiv(T, tt)),
            in_specs=[
                pl.BlockSpec((bb, C, tt), lambda b, t: (b, 0, t)),
                pl.BlockSpec((1, C, 1), lambda b, t: (0, 0, 0)),
                pl.BlockSpec((1, C, 1), lambda b, t: (0, 0, 0)),
            ],
            out_specs=pl.BlockSpec((bb, C, tt), lambda b, t: (b, 0, t)),
        ),
        compiler_params=pltpu.CompilerParams(
            dimension_semantics=("parallel", "parallel"),
            vmem_limit_bytes=vmem_limit,
        ),
    )(x, alpha_f32, beta_f32)


def ln_temporal_ref(x, alpha, beta, epsilon=1e-5):
    mean = jnp.mean(x, axis=1, keepdims=True)
    var = jnp.mean((x - mean) ** 2, axis=1, keepdims=True)
    std = jnp.sqrt(var + epsilon)
    return (x - mean) / std * alpha + beta


if __name__ == "__main__":
    key = jax.random.PRNGKey(0)

    # Primary small shape consistent with the module: (batch, dim, temporal).
    B, C, T = 2, 4, 8
    x = jax.random.normal(key, (B, C, T), dtype=jnp.float32)
    alpha = jnp.ones((1, C, 1), dtype=jnp.float32)   # nn.Parameter(torch.ones)
    beta = jnp.zeros((1, C, 1), dtype=jnp.float32)   # nn.Parameter(torch.zeros)

    out = jax.block_until_ready(ln_temporal(x, alpha, beta))
    ref = ln_temporal_ref(x, alpha, beta)
    assert out.shape == (B, C, T)
    assert jnp.allclose(out, ref, atol=1e-5, rtol=1e-5), "mismatch vs reference"

    # Second case: ragged (non-128-multiple) T handled by partial-block masking
    # (no wrapper pad/slice), non-trivial alpha/beta, larger mean offset to
    # exercise the two-pass variance path.
    B2, C2, T2 = 2, 16, 300
    k1, k2, k3 = jax.random.split(key, 3)
    x2 = jax.random.normal(k1, (B2, C2, T2), dtype=jnp.float32) + 5.0
    alpha2 = jax.random.normal(k2, (1, C2, 1), dtype=jnp.float32)
    beta2 = jax.random.normal(k3, (1, C2, 1), dtype=jnp.float32)
    out2 = jax.block_until_ready(ln_temporal(x2, alpha2, beta2))
    ref2 = ln_temporal_ref(x2, alpha2, beta2)
    assert out2.shape == (B2, C2, T2)
    assert jnp.allclose(out2, ref2, atol=1e-4, rtol=1e-4), "mismatch vs reference (tiled case)"

    print("KERNEL_OK")
</pallas_src>

<mosaic_0001>
module attributes {stable_mosaic.version = 11 : i64} {
  func.func @_ln_temporal_kernel(%arg0: i32, %arg1: i32, %arg2: memref<2x4x128xf32, #tpu.memory_space<vmem>>, %arg3: memref<1x4x1xf32, #tpu.memory_space<vmem>>, %arg4: memref<1x4x1xf32, #tpu.memory_space<vmem>>, %arg5: memref<2x4x128xf32, #tpu.memory_space<vmem>>) attributes {dimension_semantics = [#tpu.dimension_semantics<parallel>, #tpu.dimension_semantics<parallel>], iteration_bounds = array<i64: 1, 1>, scalar_prefetch = 0 : i64, scratch_operands = 0 : i64, tpu.core_type = #tpu.core_type<tc>, window_params = [{transform_indices = @transform_0, window_bounds = array<i64: 2, 4, 128>}, {pipeline_mode = #tpu.pipeline_mode<synchronous>, transform_indices = @transform_1, window_bounds = array<i64: 1, 4, 1>}, {pipeline_mode = #tpu.pipeline_mode<synchronous>, transform_indices = @transform_2, window_bounds = array<i64: 1, 4, 1>}, {transform_indices = @transform_3, window_bounds = array<i64: 2, 4, 128>}]} {
    %c0 = arith.constant 0 : index
    %c0_0 = arith.constant 0 : index
    %c0_1 = arith.constant 0 : index
    %0 = vector.load %arg2[%c0, %c0_0, %c0_1] : memref<2x4x128xf32, #tpu.memory_space<vmem>>, vector<2x4x128xf32>
    %cst = arith.constant dense<0.000000e+00> : vector<2x128xf32>
    %1 = vector.multi_reduction <add>, %0, %cst [1] : vector<2x4x128xf32> to vector<2x128xf32>
    %2 = vector.shape_cast %1 : vector<2x128xf32> to vector<2x1x128xf32>
    %cst_2 = arith.constant 2.500000e-01 : f32
    %3 = vector.broadcast %cst_2 : f32 to vector<2x1x128xf32>
    %4 = arith.mulf %2, %3 : vector<2x1x128xf32>
    %5 = vector.broadcast %4 : vector<2x1x128xf32> to vector<2x4x128xf32>
    %6 = arith.subf %0, %5 : vector<2x4x128xf32>
    %7 = arith.mulf %6, %6 : vector<2x4x128xf32>
    %cst_3 = arith.constant dense<0.000000e+00> : vector<2x128xf32>
    %8 = vector.multi_reduction <add>, %7, %cst_3 [1] : vector<2x4x128xf32> to vector<2x128xf32>
    %9 = vector.shape_cast %8 : vector<2x128xf32> to vector<2x1x128xf32>
    %cst_4 = arith.constant 2.500000e-01 : f32
    %10 = vector.broadcast %cst_4 : f32 to vector<2x1x128xf32>
    %11 = arith.mulf %9, %10 : vector<2x1x128xf32>
    %cst_5 = arith.constant 9.99999974E-6 : f32
    %12 = vector.broadcast %cst_5 : f32 to vector<2x1x128xf32>
    %13 = arith.addf %11, %12 : vector<2x1x128xf32>
    %14 = math.rsqrt %13 : vector<2x1x128xf32>
    %15 = vector.broadcast %14 : vector<2x1x128xf32> to vector<2x4x128xf32>
    %16 = arith.mulf %6, %15 : vector<2x4x128xf32>
    %c0_6 = arith.constant 0 : index
    %c0_7 = arith.constant 0 : index
    %c0_8 = arith.constant 0 : index
    %17 = vector.load %arg3[%c0_6, %c0_7, %c0_8] : memref<1x4x1xf32, #tpu.memory_space<vmem>>, vector<1x4x1xf32>
    %18 = vector.broadcast %17 : vector<1x4x1xf32> to vector<2x4x128xf32>
    %19 = arith.mulf %16, %18 : vector<2x4x128xf32>
    %c0_9 = arith.constant 0 : index
    %c0_10 = arith.constant 0 : index
    %c0_11 = arith.constant 0 : index
    %20 = vector.load %arg4[%c0_9, %c0_10, %c0_11] : memref<1x4x1xf32, #tpu.memory_space<vmem>>, vector<1x4x1xf32>
    %21 = vector.broadcast %20 : vector<1x4x1xf32> to vector<2x4x128xf32>
    %22 = arith.addf %19, %21 : vector<2x4x128xf32>
    %c0_12 = arith.constant 0 : index
    %c0_13 = arith.constant 0 : index
    %c0_14 = arith.constant 0 : index
    %23 = vector.load %arg5[%c0_12, %c0_13, %c0_14] : memref<2x4x128xf32, #tpu.memory_space<vmem>>, vector<2x4x128xf32>
    tpu.vector_store %arg5[%c0_12, %c0_13, %c0_14], %22 {strides = array<i32>} : memref<2x4x128xf32, #tpu.memory_space<vmem>>, vector<2x4x128xf32>,
    return
  }
  func.func @transform_0(%arg0: i32, %arg1: i32) -> (i32, i32, i32) {
    %c0_i32 = arith.constant 0 : i32
    %c0_i32_0 = arith.constant 0 : i32
    return %arg0, %c0_i32, %arg1 : i32, i32, i32
  }
  func.func @transform_1(%arg0: i32, %arg1: i32) -> (i32, i32, i32) {
    %c0_i32 = arith.constant 0 : i32
    %c0_i32_0 = arith.constant 0 : i32
    %c0_i32_1 = arith.constant 0 : i32
    %c0_i32_2 = arith.constant 0 : i32
    return %c0_i32, %c0_i32_0, %c0_i32_1 : i32, i32, i32
  }
  func.func @transform_2(%arg0: i32, %arg1: i32) -> (i32, i32, i32) {
    %c0_i32 = arith.constant 0 : i32
    %c0_i32_0 = arith.constant 0 : i32
    %c0_i32_1 = arith.constant 0 : i32
    %c0_i32_2 = arith.constant 0 : i32
    return %c0_i32, %c0_i32_0, %c0_i32_1 : i32, i32, i32
  }
  func.func @transform_3(%arg0: i32, %arg1: i32) -> (i32, i32, i32) {
    %c0_i32 = arith.constant 0 : i32
    %c0_i32_0 = arith.constant 0 : i32
    return %arg0, %c0_i32, %arg1 : i32, i32, i32
  }
}

</mosaic_0001>

<bundles_post_ra>
// kernel: tpu_custom_call.1
= control target key start
LH: loop header
LB: loop body
LE: loop exit
PB: predicated region body
PF: predicated region fallthrough
CT: control target
= control target key end

     0   :  { %v125_v1 = vmov 0   ;;  %s168_s0 = inlined_call_operand.vmem [shape: f32[2,4,8], index: 0, kind: input, shape index: {}]   ;;  %s169_s1 = inlined_call_operand.vmem [shape: f32[1,4,1], index: 1, kind: input, shape index: {}]   ;;  %s170_s2 = inlined_call_operand.vmem [shape: f32[1,4,1], index: 2, kind: input, shape index: {}]   ;;  %s171_s3 = inlined_call_operand.hbm [shape: f32[2,4,8], index: 3, kind: output, shape index: {}]  }
   0x1   :  { %v60_v0 = vld [vmem:[%s169_s1] sm:$0xf]  ;;  %98 = vset.pattern.permute.xlu0 %v125_v1 }
   0x2   :  { %8 = vsyncpa [#allocation3], 0  ;;  %63 = vperm.xlu0 %98, %v60_v0   ;;  %v68_v2 = vld [vmem:[%s170_s2] sm:$0xf]  ;;  %vm17_vm0 = vcmask 1043456  }
   0x3   :  { %v15_v3 = vld [vmem:[%s168_s0] sm:$0xf]  ;;  %v16_v4 = vld [vmem:[%s168_s0 + $0x4] sm:$0xf]  ;;  %s126_s0 = smov [#allocation2]  }
   0x4   :  { %v18_v5 = vsel %vm17_vm0, %v15_v3, 0.0  ;;  %v25_v6 = vsel %vm17_vm0, %v16_v4, 0.0  ;;  %s83_s1 = sshll.u32 %s126_s0, 4  ;;  %s84_s1 = int_to_ptr.vmem [resolvable:$true] %s83_s1 }
   0x5   :  { %v19_v7 = vrot.slane %v18_v5, 4  ;;  %v26_v8 = vrot.slane %v25_v6, 4  ;;  %s103_s2 = scalar_lea.vmem %s84_s1, 128  ;;  %p108_p1 = scmp.lt.s32.totalorder %s84_s1, %s84_s1 }
   0x6   :  { %71 = vperm.xlu0 %98, %v68_v2   ;;  %p104_p0 = scmp.ne.s32.totalorder %s84_s1, %s103_s2  ;;  %p109_p2 = scmp.lt.s32.totalorder %s103_s2, %s103_s2 }
   0x7   :  { %v20_v9 = vadd.f32 %v19_v7, %v18_v5  ;;  %v27_v10 = vadd.f32 %v26_v8, %v25_v6 }
   0x8   :  { %p110_p3 = por %p109_p2, %p108_p1 }
   0x9   :  { %v21_v11 = vrot.slane %v20_v9, 2  ;;  %v28_v12 = vrot.slane %v27_v10, 2 }
   0xa   :  { %p111_p4 = pnand %p110_p3, %p104_p0 }
   0xb   :  { %v22_v13 = vadd.f32 %v21_v11, %v20_v9  ;;  %v29_v14 = vadd.f32 %v28_v12, %v27_v10 }
   0xd   :  { %v23_v15 = vrot.slane %v22_v13, 1  ;;  %v30_v16 = vrot.slane %v29_v14, 1 }
   0xf   :  { %v24_v17 = vadd.f32 %v23_v15, %v22_v13  ;;  %v31_v18 = vadd.f32 %v30_v16, %v29_v14 }
  0x11   :  { %v32_v19 = vmul.f32 0.25, %v24_v17  ;;  %v33_v20 = vmul.f32 0.25, %v31_v18 }
  0x13   :  { %v34_v21 = vsub.f32 %v15_v3, %v32_v19  ;;  %v35_v22 = vsub.f32 %v16_v4, %v33_v20 }
  0x15   :  { %v36_v23 = vmul.f32 %v34_v21, %v34_v21  ;;  %v37_v24 = vmul.f32 %v35_v22, %v35_v22 }
  0x17   :  { %v38_v25 = vsel %vm17_vm0, %v36_v23, 0.0  ;;  %v45_v26 = vsel %vm17_vm0, %v37_v24, 0.0 }
  0x18   :  { %v39_v27 = vrot.slane %v38_v25, 4  ;;  %v46_v28 = vrot.slane %v45_v26, 4 }
  0x1a   :  { %v40_v29 = vadd.f32 %v39_v27, %v38_v25  ;;  %v47_v30 = vadd.f32 %v46_v28, %v45_v26 }
  0x1c   :  { %v41_v31 = vrot.slane %v40_v29, 2  ;;  %v48_v32 = vrot.slane %v47_v30, 2 }
  0x1e   :  { %v42_v33 = vadd.f32 %v41_v31, %v40_v29  ;;  %v49_v34 = vadd.f32 %v48_v32, %v47_v30 }
  0x20   :  { %v43_v35 = vrot.slane %v42_v33, 1  ;;  %v50_v36 = vrot.slane %v49_v34, 1 }
  0x22   :  { %v44_v37 = vadd.f32 %v43_v35, %v42_v33  ;;  %v51_v38 = vadd.f32 %v50_v36, %v49_v34 }
  0x24   :  { %v52_v39 = vmul.f32 0.25, %v44_v37  ;;  %v53_v40 = vmul.f32 0.25, %v51_v38 }
  0x26   :  { %v54_v41 = vadd.f32 1e-05, %v52_v39  ;;  %v55_v42 = vadd.f32 1e-05, %v53_v40 }
  0x28   :  { %99 = vrsqrt.f32 %v54_v41 }
  0x29   :  { %101 = vrsqrt.f32 %v55_v42 }
  0x35   :  { %v100_v43 = vpop.eup %99 }
  0x36   :  { %v102_v44 = vpop.eup %101  ;;  %v58_v45 = vmul.f32 %v100_v43, %v34_v21 }
  0x37   :  { %v59_v46 = vmul.f32 %v102_v44, %v35_v22 }
  0x7d   :  { %v64_v47 = vpop.permute.xlu0 %63 }
  0x7e   :  { %v66_v48 = vmul.f32 %v64_v47, %v58_v45  ;;  %v67_v49 = vmul.f32 %v64_v47, %v59_v46 }
  0x81   :  { %v72_v50 = vpop.permute.xlu0 %71 }
  0x82   :  { %v74_v51 = vadd.f32 %v72_v50, %v66_v48  ;;  %v75_v52 = vadd.f32 %v72_v50, %v67_v49 }
  0x84   :  { %76 = vst [vmem:[#allocation2] sm:$0xf] %v74_v51  ;;  %77 = vst [vmem:[#allocation2 + $0x4] sm:$0xf] %v75_v52 }
  0x85   :  { %114 = shalt.err (!%p111_p4)
}
  0x86   :  { %s127_s20 = smov 64   ;;  %s128_s21 = smov 4  }
  0x87   :  { %89 = dma.vmem_to_hbm [thread:$0]  %s84_s1, 128, %s171_s3, [#allocation3], %s127_s20, %s127_s20, %s128_s21  }
  0x88   :  { %123 = dma.done.wait [#allocation3], 128  }
  0x89   :  { %124 = vsyncadd [#allocation3], 4294967168 }
  0x8a   :  { %93 = vsyncpa [#allocation3], 1 }

</bundles_post_ra>
